<compile_context>
chip_gen: v6e
topology: v6e:2x2x1
jax: 0.10.0
libtpu: 0.0.40
codegen_flags: <defaults>
</compile_context>

<pallas_src>
import functools

import jax
import jax.numpy as jnp
from jax.experimental import pallas as pl
from jax.experimental.pallas import tpu as pltpu


def _round_up(a, m):
    return ((a + m - 1) // m) * m


def _cdiv(a, b):
    return (a + b - 1) // b


# ----------------------------------------------------------------------------
# Pallas kernel: fused  relu(W_L@xL + W_R@xR [+ f0 terms] + b1) -> relu(W2@h + b2)
# ----------------------------------------------------------------------------
def _make_fft_kernel(half, tl, use_f0):
    """xL is the current time block; xR is the same block shifted left by `half`
    lanes, with the spill-over coming from a small tail block that starts where
    the current block ends (overlapping windows without a concat round-trip)."""

    def kernel(*refs):
        if use_f0:
            (xm_ref, xt_ref, fm_ref, ft_ref,
             wl_ref, wr_ref, wfl_ref, wfr_ref,
             b1_ref, w2_ref, b2_ref, o_ref) = refs
        else:
            (xm_ref, xt_ref,
             wl_ref, wr_ref,
             b1_ref, w2_ref, b2_ref, o_ref) = refs

        xm = xm_ref[...]                                           # (C_in, tl)
        x_cat = jnp.concatenate([xm, xt_ref[...]], axis=-1)        # (C_in, tl + tw)
        x_r = x_cat[:, half:half + tl]                             # lane shift (XLU)

        # First 1x1-conv layer: two (or four) tiny-K dots, f32 MXU accumulation.
        h = jnp.dot(wl_ref[...], xm, preferred_element_type=jnp.float32)
        h = h + jnp.dot(wr_ref[...], x_r, preferred_element_type=jnp.float32)
        if use_f0:
            fm = fm_ref[...]                                       # (1, tl)
            f_cat = jnp.concatenate([fm, ft_ref[...]], axis=-1)
            h = h + jnp.dot(wfl_ref[...], fm, preferred_element_type=jnp.float32)
            h = h + jnp.dot(wfr_ref[...], f_cat[:, half:half + tl],
                            preferred_element_type=jnp.float32)

        h = jnp.maximum(h + b1_ref[...], 0.0)                      # f32 bias + ReLU (VPU)

        # Second 1x1-conv layer.
        out = jnp.dot(w2_ref[...], h.astype(w2_ref.dtype),
                      preferred_element_type=jnp.float32)
        o_ref[...] = jnp.maximum(out + b2_ref[...], 0.0).astype(o_ref.dtype)

    return kernel


def _choose_time_tile(B, L, tw):
    """Large lane-dense time tile (a multiple of the tail width tw, itself a
    multiple of 128).  Per-tile VMEM is tiny (~C * tl * 4B), so the only caps are
    ~8192 lanes (keeps double-buffered VMEM far under the scoped limit on every
    generation, incl. v7x's 64 MiB) and keeping >= 2 total grid steps so both
    v7x TensorCores get work."""
    cap = max(tw, (8192 // tw) * tw)
    tl = min(_round_up(L, tw), cap)
    if B * _cdiv(L, tl) < 2:                       # single-step grid -> split for v7x
        tl_split = _round_up(_cdiv(L, 2), tw)
        if tw <= tl_split < tl:
            tl = tl_split
    return tl


def _fused_fft_conv(x, f0, w_l, w_r, w_f0_l, w_f0_r, b1, w2, b2, *, half, out_dtype):
    """x: (B, C_in, T) channels-first, f0: (B, 1, T) or None.
    Weights are (C_out, C_in*) in the compute dtype; b1/b2: (C_out, 1) float32.
    Returns (B, C_out, L) with L = T - half."""
    B, c_in, T = x.shape
    c_out = w2.shape[0]
    L = T - half
    use_f0 = f0 is not None

    tw = _round_up(max(half, 1), 128)              # tail-block width (lane granularity)
    tl = _choose_time_tile(B, L, tw)
    nt = _cdiv(L, tl)                              # ragged final block is masked
    r = tl // tw
    n_tail = _cdiv(T, tw)

    def main_map(b, t):
        return (b, 0, t)

    def tail_map(b, t):
        # Tail block starts where the main block ends (element offset (t+1)*tl =
        # block index (t+1)*r in units of tw).  Clamp for the last ragged tile,
        # whose valid output lanes never read past the main block.
        return (b, 0, jnp.minimum((t + 1) * r, n_tail - 1))

    def _resident(a):                              # weights stay resident in VMEM
        return pl.BlockSpec(a.shape, lambda b, t: (0, 0))

    in_specs = [pl.BlockSpec((None, c_in, tl), main_map),
                pl.BlockSpec((None, c_in, tw), tail_map)]
    operands = [x, x]
    if use_f0:
        in_specs += [pl.BlockSpec((None, 1, tl), main_map),
                     pl.BlockSpec((None, 1, tw), tail_map)]
        operands += [f0, f0]

    w_list = [w_l, w_r] + ([w_f0_l, w_f0_r] if use_f0 else []) + [b1, w2, b2]
    in_specs += [_resident(a) for a in w_list]
    operands += w_list

    flops = 2 * B * L * c_out * (2 * c_in + (2 if use_f0 else 0) + c_out)
    bytes_accessed = (B * c_in * (L + nt * tw) * x.dtype.itemsize
                      + (B * (L + nt * tw) * f0.dtype.itemsize if use_f0 else 0)
                      + B * c_out * L * jnp.dtype(out_dtype).itemsize
                      + sum(a.size * a.dtype.itemsize for a in w_list))

    return pl.pallas_call(
        _make_fft_kernel(half, tl, use_f0),
        out_shape=jax.ShapeDtypeStruct((B, c_out, L), out_dtype),
        grid=(B, nt),
        in_specs=in_specs,
        out_specs=pl.BlockSpec((None, c_out, tl), main_map),
        compiler_params=pltpu.CompilerParams(
            dimension_semantics=("parallel", "parallel")),
        cost_estimate=pl.CostEstimate(flops=flops, transcendentals=0,
                                      bytes_accessed=bytes_accessed),
    )(*operands)


# ----------------------------------------------------------------------------
# Parameter init (deterministic, PyTorch Conv1d-style uniform fan-in init)
# ----------------------------------------------------------------------------
def _conv1x1_params(key, cin, cout):
    kw, kb = jax.random.split(key)
    bound = 1.0 / (cin ** 0.5)
    w = jax.random.uniform(kw, (cout, cin), jnp.float32, -bound, bound)  # (C_out, C_in)
    b = jax.random.uniform(kb, (cout,), jnp.float32, -bound, bound)
    return w, b[:, None]                                                 # bias (C_out, 1)


def init_fft_layer_params(key, in_channels, out_channels, layer_idx):
    keys = jax.random.split(key, 8)
    params = {
        "conv1d_L": _conv1x1_params(keys[0], in_channels, out_channels),
        "conv1d_R": _conv1x1_params(keys[1], in_channels, out_channels),
        "conv1d_out": _conv1x1_params(keys[2], out_channels, out_channels),
    }
    if layer_idx == 0:
        params["conv1d_f0_L"] = _conv1x1_params(keys[3], 1, out_channels)
        params["conv1d_f0_R"] = _conv1x1_params(keys[4], 1, out_channels)
        params["conv1d_phonemes_L"] = _conv1x1_params(keys[5], 1, out_channels)
        params["conv1d_phonemes_R"] = _conv1x1_params(keys[6], 1, out_channels)
    return params


# ----------------------------------------------------------------------------
# Forward (mirrors FFTLayer.forward control flow exactly)
# ----------------------------------------------------------------------------
@functools.partial(jax.jit,
                   static_argnames=("input_size", "compute_dtype", "out_dtype"))
def fft_layer_forward(params, x, f0=None, phonemes=None, *, input_size,
                      compute_dtype=jnp.bfloat16, out_dtype=jnp.float32):
    """x: (B, C_in, T) NCL.  Returns (B, C_out, T - input_size // 2) in out_dtype.

    compute_dtype applies only to the x / f0 / weight operand streams (the kernel
    is HBM bound); MXU accumulation and the bias/ReLU VPU math stay f32, so the
    bf16 default is fine on v5e/v6e/v7x.  Supply x already in compute_dtype
    upstream to avoid a cast round-trip.
    """
    assert input_size % 2 == 0 and input_size >= 2, \
        "odd input_size gives mismatched L/R window lengths"
    half = input_size // 2

    # Original control-flow quirk reproduced exactly: when BOTH f0 and phonemes
    # are given, the 6-term sum is immediately overwritten by the trailing `else`
    # branch (x_L + x_R), so only the (f0 given, phonemes=None) case uses the f0
    # convs; the phonemes convs never influence the output.
    use_f0 = (f0 is not None) and (phonemes is None)

    w_l, b_l = params["conv1d_L"]
    w_r, b_r = params["conv1d_R"]
    w_out, b_out = params["conv1d_out"]
    b1 = b_l + b_r                                  # bias pre-sum (f32)

    w_f0_l = w_f0_r = None
    f0_c = None
    if use_f0:
        wfl, bfl = params["conv1d_f0_L"]
        wfr, bfr = params["conv1d_f0_R"]
        w_f0_l = wfl.astype(compute_dtype)
        w_f0_r = wfr.astype(compute_dtype)
        b1 = b1 + bfl + bfr
        f0_c = f0.astype(compute_dtype)

    return _fused_fft_conv(
        x.astype(compute_dtype), f0_c,
        w_l.astype(compute_dtype), w_r.astype(compute_dtype), w_f0_l, w_f0_r,
        b1.astype(jnp.float32), w_out.astype(compute_dtype),
        b_out.astype(jnp.float32), half=half, out_dtype=out_dtype)


# ----------------------------------------------------------------------------
# Pure-JAX reference (for correctness check)
# ----------------------------------------------------------------------------
def reference_forward(params, x, f0=None, phonemes=None, *, input_size):
    def conv1x1(a, wb):
        w, b = wb                                   # w: (C_out, C_in), b: (C_out, 1)
        return jnp.einsum("oc,bct->bot", w, a) + b[None, :, :]

    neg = (-input_size) // 2
    half = input_size // 2
    x_L = conv1x1(x[:, :, :neg], params["conv1d_L"])
    x_R = conv1x1(x[:, :, half:], params["conv1d_R"])
    if f0 is not None and phonemes is not None:
        xx = (x_L + x_R
              + conv1x1(f0[:, :, :neg], params["conv1d_f0_L"])
              + conv1x1(f0[:, :, half:], params["conv1d_f0_R"])
              + conv1x1(phonemes[:, :, :neg], params["conv1d_phonemes_L"])
              + conv1x1(phonemes[:, :, half:], params["conv1d_phonemes_R"]))
    if f0 is not None and phonemes is None:
        xx = (x_L + x_R
              + conv1x1(f0[:, :, :neg], params["conv1d_f0_L"])
              + conv1x1(f0[:, :, half:], params["conv1d_f0_R"]))
    else:
        xx = x_L + x_R                              # overwrites 6-term sum (original quirk)
    h = jnp.maximum(xx, 0.0)
    return jnp.maximum(conv1x1(h, params["conv1d_out"]), 0.0)


# ----------------------------------------------------------------------------
if __name__ == "__main__":
    pkey, xkey, fkey, phkey, x2key, f2key = jax.random.split(jax.random.PRNGKey(0), 6)

    # f32 matmuls may use bf16 MXU passes at default precision on TPU, and the
    # kernel / XLA reference may pick different pass counts -> modest tolerance.
    F32_TOL = dict(atol=2e-2, rtol=2e-2)

    # --- small config matching the module's intended use ----------------------
    B, C_in, C_out, T, input_size = 2, 4, 8, 16, 16
    L = T - input_size // 2
    params = init_fft_layer_params(pkey, C_in, C_out, layer_idx=0)
    x = jax.random.normal(xkey, (B, C_in, T), jnp.float32)
    f0 = jax.random.normal(fkey, (B, 1, T), jnp.float32)
    phonemes = jax.random.normal(phkey, (B, 1, T), jnp.float32)

    # case 1: x + f0 (phonemes=None) -> f0 convs contribute
    out1 = jax.block_until_ready(fft_layer_forward(
        params, x, f0, None, input_size=input_size, compute_dtype=jnp.float32))
    ref1 = reference_forward(params, x, f0=f0, phonemes=None, input_size=input_size)
    assert out1.shape == (B, C_out, L)
    assert jnp.allclose(out1, ref1, **F32_TOL)

    # case 2: x only
    out2 = jax.block_until_ready(fft_layer_forward(
        params, x, input_size=input_size, compute_dtype=jnp.float32))
    ref2 = reference_forward(params, x, input_size=input_size)
    assert jnp.allclose(out2, ref2, **F32_TOL)

    # case 3: x + f0 + phonemes -> original control flow collapses to x-only path
    out3 = jax.block_until_ready(fft_layer_forward(
        params, x, f0, phonemes, input_size=input_size, compute_dtype=jnp.float32))
    ref3 = reference_forward(params, x, f0=f0, phonemes=phonemes, input_size=input_size)
    assert jnp.allclose(out3, ref3, **F32_TOL)
    assert jnp.allclose(out3, out2, atol=1e-6)

    # case 4: default bf16 operand streams (f32 accumulation / f32 VPU math)
    out4 = jax.block_until_ready(fft_layer_forward(
        params, x, f0, None, input_size=input_size))
    assert jnp.allclose(out4, ref1, atol=6e-2, rtol=6e-2)

    # --- longer sequence: multi-tile grid, real overlapping tail reads,
    #     ragged (masked) last block, and half > 128 ---------------------------
    B2, T2, input_size2 = 1, 2000, 300             # half = 150 -> tail width 256
    L2 = T2 - input_size2 // 2
    params2 = init_fft_layer_params(jax.random.PRNGKey(7), C_in, C_out, layer_idx=0)
    x2 = jax.random.normal(x2key, (B2, C_in, T2), jnp.float32)
    f02 = jax.random.normal(f2key, (B2, 1, T2), jnp.float32)

    out5 = jax.block_until_ready(fft_layer_forward(
        params2, x2, f02, None, input_size=input_size2, compute_dtype=jnp.float32))
    ref5 = reference_forward(params2, x2, f0=f02, phonemes=None, input_size=input_size2)
    assert out5.shape == (B2, C_out, L2)
    assert jnp.allclose(out5, ref5, **F32_TOL)

    out6 = jax.block_until_ready(fft_layer_forward(
        params2, x2, input_size=input_size2, compute_dtype=jnp.float32))
    ref6 = reference_forward(params2, x2, input_size=input_size2)
    assert jnp.allclose(out6, ref6, **F32_TOL)

    print("KERNEL_OK")
</pallas_src>

<mosaic_0001>
module attributes {stable_mosaic.version = 11 : i64} {
  func.func @kernel(%arg0: i32, %arg1: i32, %arg2: memref<1x4x128xf32, #tpu.memory_space<vmem>>, %arg3: memref<1x4x128xf32, #tpu.memory_space<vmem>>, %arg4: memref<1x1x128xf32, #tpu.memory_space<vmem>>, %arg5: memref<1x1x128xf32, #tpu.memory_space<vmem>>, %arg6: memref<8x4xf32, #tpu.memory_space<vmem>>, %arg7: memref<8x4xf32, #tpu.memory_space<vmem>>, %arg8: memref<8x1xf32, #tpu.memory_space<vmem>>, %arg9: memref<8x1xf32, #tpu.memory_space<vmem>>, %arg10: memref<8x1xf32, #tpu.memory_space<vmem>>, %arg11: memref<8x8xf32, #tpu.memory_space<vmem>>, %arg12: memref<8x1xf32, #tpu.memory_space<vmem>>, %arg13: memref<1x8x128xf32, #tpu.memory_space<vmem>>) attributes {dimension_semantics = [#tpu.dimension_semantics<parallel>, #tpu.dimension_semantics<parallel>], iteration_bounds = array<i64: 2, 1>, scalar_prefetch = 0 : i64, scratch_operands = 0 : i64, tpu.core_type = #tpu.core_type<tc>, window_params = [{transform_indices = @transform_0, window_bounds = array<i64: 1, 4, 128>}, {transform_indices = @transform_1, window_bounds = array<i64: 1, 4, 128>}, {transform_indices = @transform_2, window_bounds = array<i64: 1, 1, 128>}, {transform_indices = @transform_3, window_bounds = array<i64: 1, 1, 128>}, {pipeline_mode = #tpu.pipeline_mode<synchronous>, transform_indices = @transform_4, window_bounds = array<i64: 8, 4>}, {pipeline_mode = #tpu.pipeline_mode<synchronous>, transform_indices = @transform_5, window_bounds = array<i64: 8, 4>}, {pipeline_mode = #tpu.pipeline_mode<synchronous>, transform_indices = @transform_6, window_bounds = array<i64: 8, 1>}, {pipeline_mode = #tpu.pipeline_mode<synchronous>, transform_indices = @transform_7, window_bounds = array<i64: 8, 1>}, {pipeline_mode = #tpu.pipeline_mode<synchronous>, transform_indices = @transform_8, window_bounds = array<i64: 8, 1>}, {pipeline_mode = #tpu.pipeline_mode<synchronous>, transform_indices = @transform_9, window_bounds = array<i64: 8, 8>}, {pipeline_mode = #tpu.pipeline_mode<synchronous>, transform_indices = @transform_10, window_bounds = array<i64: 8, 1>}, {transform_indices = @transform_11, window_bounds = array<i64: 1, 8, 128>}]} {
    %c0 = arith.constant 0 : index
    %c0_0 = arith.constant 0 : index
    %c0_1 = arith.constant 0 : index
    %0 = vector.load %arg2[%c0, %c0_0, %c0_1] : memref<1x4x128xf32, #tpu.memory_space<vmem>>, vector<1x4x128xf32>
    %1 = vector.shape_cast %0 : vector<1x4x128xf32> to vector<4x128xf32>
    %c0_2 = arith.constant 0 : index
    %c0_3 = arith.constant 0 : index
    %c0_4 = arith.constant 0 : index
    %2 = vector.load %arg3[%c0_2, %c0_3, %c0_4] : memref<1x4x128xf32, #tpu.memory_space<vmem>>, vector<1x4x128xf32>
    %3 = vector.shape_cast %2 : vector<1x4x128xf32> to vector<4x128xf32>
    %4 = tpu.concatenate %1, %3 in 1 : vector<4x128xf32>, vector<4x128xf32> -> vector<4x256xf32>
    %5 = vector.extract_strided_slice %4 {offsets = [0, 8], sizes = [4, 128], strides = [1, 1]} : vector<4x256xf32> to vector<4x128xf32>
    %c0_5 = arith.constant 0 : index
    %c0_6 = arith.constant 0 : index
    %6 = vector.load %arg6[%c0_5, %c0_6] : memref<8x4xf32, #tpu.memory_space<vmem>>, vector<8x4xf32>
    %cst = arith.constant dense<0.000000e+00> : vector<8x128xf32>
    %7 = tpu.matmul %6, %1, %cst {dimension_numbers = #tpu.dot_dimension_numbers<[1], [0], [0], [1], [0, 0, 1, 1], [], []>} : vector<8x4xf32>, vector<4x128xf32>, vector<8x128xf32> -> vector<8x128xf32>
    %c0_7 = arith.constant 0 : index
    %c0_8 = arith.constant 0 : index
    %8 = vector.load %arg7[%c0_7, %c0_8] : memref<8x4xf32, #tpu.memory_space<vmem>>, vector<8x4xf32>
    %cst_9 = arith.constant dense<0.000000e+00> : vector<8x128xf32>
    %9 = tpu.matmul %8, %5, %cst_9 {dimension_numbers = #tpu.dot_dimension_numbers<[1], [0], [0], [1], [0, 0, 1, 1], [], []>} : vector<8x4xf32>, vector<4x128xf32>, vector<8x128xf32> -> vector<8x128xf32>
    %10 = arith.addf %7, %9 : vector<8x128xf32>
    %c0_10 = arith.constant 0 : index
    %c0_11 = arith.constant 0 : index
    %c0_12 = arith.constant 0 : index
    %11 = vector.load %arg4[%c0_10, %c0_11, %c0_12] : memref<1x1x128xf32, #tpu.memory_space<vmem>>, vector<1x1x128xf32>
    %12 = vector.shape_cast %11 : vector<1x1x128xf32> to vector<1x128xf32>
    %c0_13 = arith.constant 0 : index
    %c0_14 = arith.constant 0 : index
    %c0_15 = arith.constant 0 : index
    %13 = vector.load %arg5[%c0_13, %c0_14, %c0_15] : memref<1x1x128xf32, #tpu.memory_space<vmem>>, vector<1x1x128xf32>
    %14 = vector.shape_cast %13 : vector<1x1x128xf32> to vector<1x128xf32>
    %15 = tpu.concatenate %12, %14 in 1 : vector<1x128xf32>, vector<1x128xf32> -> vector<1x256xf32>
    %c0_16 = arith.constant 0 : index
    %c0_17 = arith.constant 0 : index
    %16 = vector.load %arg8[%c0_16, %c0_17] : memref<8x1xf32, #tpu.memory_space<vmem>>, vector<8x1xf32>
    %cst_18 = arith.constant dense<0.000000e+00> : vector<8x128xf32>
    %17 = tpu.matmul %16, %12, %cst_18 {dimension_numbers = #tpu.dot_dimension_numbers<[1], [0], [0], [1], [0, 0, 1, 1], [], []>} : vector<8x1xf32>, vector<1x128xf32>, vector<8x128xf32> -> vector<8x128xf32>
    %18 = arith.addf %10, %17 : vector<8x128xf32>
    %c0_19 = arith.constant 0 : index
    %c0_20 = arith.constant 0 : index
    %19 = vector.load %arg9[%c0_19, %c0_20] : memref<8x1xf32, #tpu.memory_space<vmem>>, vector<8x1xf32>
    %20 = vector.extract_strided_slice %15 {offsets = [0, 8], sizes = [1, 128], strides = [1, 1]} : vector<1x256xf32> to vector<1x128xf32>
    %cst_21 = arith.constant dense<0.000000e+00> : vector<8x128xf32>
    %21 = tpu.matmul %19, %20, %cst_21 {dimension_numbers = #tpu.dot_dimension_numbers<[1], [0], [0], [1], [0, 0, 1, 1], [], []>} : vector<8x1xf32>, vector<1x128xf32>, vector<8x128xf32> -> vector<8x128xf32>
    %22 = arith.addf %18, %21 : vector<8x128xf32>
    %c0_22 = arith.constant 0 : index
    %c0_23 = arith.constant 0 : index
    %23 = vector.load %arg10[%c0_22, %c0_23] : memref<8x1xf32, #tpu.memory_space<vmem>>, vector<8x1xf32>
    %24 = vector.broadcast %23 : vector<8x1xf32> to vector<8x128xf32>
    %25 = arith.addf %22, %24 : vector<8x128xf32>
    %cst_24 = arith.constant 0.000000e+00 : f32
    %26 = vector.broadcast %cst_24 : f32 to vector<8x128xf32>
    %27 = arith.maximumf %25, %26 : vector<8x128xf32>
    %c0_25 = arith.constant 0 : index
    %c0_26 = arith.constant 0 : index
    %28 = vector.load %arg11[%c0_25, %c0_26] : memref<8x8xf32, #tpu.memory_space<vmem>>, vector<8x8xf32>
    %cst_27 = arith.constant dense<0.000000e+00> : vector<8x128xf32>
    %29 = tpu.matmul %28, %27, %cst_27 {dimension_numbers = #tpu.dot_dimension_numbers<[1], [0], [0], [1], [0, 0, 1, 1], [], []>} : vector<8x8xf32>, vector<8x128xf32>, vector<8x128xf32> -> vector<8x128xf32>
    %c0_28 = arith.constant 0 : index
    %c0_29 = arith.constant 0 : index
    %30 = vector.load %arg12[%c0_28, %c0_29] : memref<8x1xf32, #tpu.memory_space<vmem>>, vector<8x1xf32>
    %31 = vector.broadcast %30 : vector<8x1xf32> to vector<8x128xf32>
    %32 = arith.addf %29, %31 : vector<8x128xf32>
    %cst_30 = arith.constant 0.000000e+00 : f32
    %33 = vector.broadcast %cst_30 : f32 to vector<8x128xf32>
    %34 = arith.maximumf %32, %33 : vector<8x128xf32>
    %c0_31 = arith.constant 0 : index
    %c0_32 = arith.constant 0 : index
    %c0_33 = arith.constant 0 : index
    %35 = vector.load %arg13[%c0_31, %c0_32, %c0_33] : memref<1x8x128xf32, #tpu.memory_space<vmem>>, vector<1x8x128xf32>
    %36 = vector.shape_cast %35 : vector<1x8x128xf32> to vector<8x128xf32>
    %37 = vector.shape_cast %34 : vector<8x128xf32> to vector<1x8x128xf32>
    tpu.vector_store %arg13[%c0_31, %c0_32, %c0_33], %37 {strides = array<i32>} : memref<1x8x128xf32, #tpu.memory_space<vmem>>, vector<1x8x128xf32>,
    return
  }
  func.func @transform_0(%arg0: i32, %arg1: i32) -> (i32, i32, i32) {
    %c0_i32 = arith.constant 0 : i32
    %c0_i32_0 = arith.constant 0 : i32
    return %arg0, %c0_i32, %arg1 : i32, i32, i32
  }
  func.func @transform_1(%arg0: i32, %arg1: i32) -> (i32, i32, i32) {
    %c1_i32 = arith.constant 1 : i32
    %0 = arith.addi %arg1, %c1_i32 : i32
    %c1_i32_0 = arith.constant 1 : i32
    %1 = arith.muli %0, %c1_i32_0 : i32
    %c0_i32 = arith.constant 0 : i32
    %2 = arith.minsi %1, %c0_i32 : i32
    %c0_i32_1 = arith.constant 0 : i32
    %c0_i32_2 = arith.constant 0 : i32
    return %arg0, %c0_i32_1, %2 : i32, i32, i32
  }
  func.func @transform_2(%arg0: i32, %arg1: i32) -> (i32, i32, i32) {
    %c0_i32 = arith.constant 0 : i32
    %c0_i32_0 = arith.constant 0 : i32
    return %arg0, %c0_i32, %arg1 : i32, i32, i32
  }
  func.func @transform_3(%arg0: i32, %arg1: i32) -> (i32, i32, i32) {
    %c1_i32 = arith.constant 1 : i32
    %0 = arith.addi %arg1, %c1_i32 : i32
    %c1_i32_0 = arith.constant 1 : i32
    %1 = arith.muli %0, %c1_i32_0 : i32
    %c0_i32 = arith.constant 0 : i32
    %2 = arith.minsi %1, %c0_i32 : i32
    %c0_i32_1 = arith.constant 0 : i32
    %c0_i32_2 = arith.constant 0 : i32
    return %arg0, %c0_i32_1, %2 : i32, i32, i32
  }
  func.func @transform_4(%arg0: i32, %arg1: i32) -> (i32, i32) {
    %c0_i32 = arith.constant 0 : i32
    %c0_i32_0 = arith.constant 0 : i32
    %c0_i32_1 = arith.constant 0 : i32
    return %c0_i32, %c0_i32_0 : i32, i32
  }
  func.func @transform_5(%arg0: i32, %arg1: i32) -> (i32, i32) {
    %c0_i32 = arith.constant 0 : i32
    %c0_i32_0 = arith.constant 0 : i32
    %c0_i32_1 = arith.constant 0 : i32
    return %c0_i32, %c0_i32_0 : i32, i32
  }
  func.func @transform_6(%arg0: i32, %arg1: i32) -> (i32, i32) {
    %c0_i32 = arith.constant 0 : i32
    %c0_i32_0 = arith.constant 0 : i32
    %c0_i32_1 = arith.constant 0 : i32
    return %c0_i32, %c0_i32_0 : i32, i32
  }
  func.func @transform_7(%arg0: i32, %arg1: i32) -> (i32, i32) {
    %c0_i32 = arith.constant 0 : i32
    %c0_i32_0 = arith.constant 0 : i32
    %c0_i32_1 = arith.constant 0 : i32
    return %c0_i32, %c0_i32_0 : i32, i32
  }
  func.func @transform_8(%arg0: i32, %arg1: i32) -> (i32, i32) {
    %c0_i32 = arith.constant 0 : i32
    %c0_i32_0 = arith.constant 0 : i32
    %c0_i32_1 = arith.constant 0 : i32
    return %c0_i32, %c0_i32_0 : i32, i32
  }
  func.func @transform_9(%arg0: i32, %arg1: i32) -> (i32, i32) {
    %c0_i32 = arith.constant 0 : i32
    %c0_i32_0 = arith.constant 0 : i32
    %c0_i32_1 = arith.constant 0 : i32
    return %c0_i32, %c0_i32_0 : i32, i32
  }
  func.func @transform_10(%arg0: i32, %arg1: i32) -> (i32, i32) {
    %c0_i32 = arith.constant 0 : i32
    %c0_i32_0 = arith.constant 0 : i32
    %c0_i32_1 = arith.constant 0 : i32
    return %c0_i32, %c0_i32_0 : i32, i32
  }
  func.func @transform_11(%arg0: i32, %arg1: i32) -> (i32, i32, i32) {
    %c0_i32 = arith.constant 0 : i32
    %c0_i32_0 = arith.constant 0 : i32
    return %arg0, %c0_i32, %arg1 : i32, i32, i32
  }
}

</mosaic_0001>

<bundles_post_ra>
// kernel: fft_layer_forward.1
= control target key start
LH: loop header
LB: loop body
LE: loop exit
PB: predicated region body
PF: predicated region fallthrough
CT: control target
= control target key end

     0   :  { %s1470_s0 = inlined_call_operand.vmem [shape: f32[2,4,16], index: 0, kind: input, shape index: {}, may-alias: {0,1}]   ;;  %s1471_s1 = inlined_call_operand.vmem [shape: f32[2,4,16], index: 1, kind: input, shape index: {}, may-alias: {0,1}]   ;;  %s1472_s2 = inlined_call_operand.vmem [shape: f32[2,1,16], index: 2, kind: input, shape index: {}, may-alias: {2,3}]   ;;  %s1473_s3 = inlined_call_operand.vmem [shape: f32[2,1,16], index: 3, kind: input, shape index: {}, may-alias: {2,3}]   ;;  %s1474_s4 = inlined_call_operand.vmem [shape: f32[8,4], index: 4, kind: input, shape index: {}]   ;;  %s1475_s5 = inlined_call_operand.vmem [shape: f32[8,4], index: 5, kind: input, shape index: {}]   ;;  %s1476_s6 = inlined_call_operand.vmem [shape: f32[8,1], index: 6, kind: input, shape index: {}]   ;;  %s1477_s7 = inlined_call_operand.vmem [shape: f32[8,1], index: 7, kind: input, shape index: {}]   ;;  %s1478_s8 = inlined_call_operand.vmem [shape: f32[8,1], index: 8, kind: input, shape index: {}]   ;;  %s1479_s9 = inlined_call_operand.vmem [shape: f32[8,8], index: 9, kind: input, shape index: {}]   ;;  %s1480_s10 = inlined_call_operand.vmem [shape: f32[8,1], index: 10, kind: input, shape index: {}]   ;;  %s1481_s11 = inlined_call_operand.hbm [shape: f32[2,8,8], index: 11, kind: output, shape index: {}]  }
   0x1   :  { %1485 = sst [smem:[#allocation9_spill]] %s1472_s2 }
   0x2   :  { %16 = vsyncpa [#allocation3], 0 }
   0x3   :  { %18 = vsyncpa [#allocation3 + $0x1], 0  ;;  %s1332_s17 = smov 0   ;;  %s1334_s18 = smov 0  }
   0x4   :  { %s1336_s19 = smov 0   ;;  %s1338_s20 = smov 0  }
   0x5   :  { %s1340_s21 = smov 0   ;;  %s1342_s22 = smov 0  }
   0x6 LB: > { %1486 = sst [smem:[#allocation5_spill]] %s1253_s19  ;;  %s1072_s23 = sadd.s32 4294967295, %s1265_s22   ;;  %s1265_s22 = sphi %s1342_s22, %s24_s22   ;;  %s1261_s21 = sphi %s1340_s21, %s1496_s21   ;;  %s1257_s20 = sphi %s1338_s20, %s1495_s20   ;;  %s1253_s19 = sphi %s1336_s19, %s1494_s19   ;;  %s1249_s18 = sphi %s1334_s18, %s1498_s18   ;;  %s1245_s17 = sphi %s1332_s17, %s1497_s17  }
   0x7   : > { %1487 = sst [smem:[#allocation6_spill]] %s1261_s21  ;;  %s1073_s24 = sadd.s32 4294967294, %s1265_s22  }
   0x8   : > { %s36_s25 = sadd.s32 1, %s1261_s21  ;;  %s316_s26 = sadd.s32 1, %s1253_s19 }
   0x9   : > { %p38_p0 = scmp.ge.s32.totalorder %s36_s25, 2  ;;  %p326_p1 = scmp.ne.s32.totalorder %s1253_s19, %s1249_s18 }
   0xa   : > { %p327_p2 = scmp.eq.s32.totalorder %s1072_s23, 1  ;;  %p332_p3 = scmp.ne.s32.totalorder %s1249_s18, %s1245_s17 }
   0xb   : > { %s1500_s25 = smov (%p38_p0, %s36_s25), 0  ;;  %p333_p5 = scmp.eq.s32.totalorder %s1073_s24, 1 }
   0xc   : > { %1488 = sst [smem:[#allocation7_spill]] %s1500_s25  ;;  %p1372_p4 = por %p327_p2, %p326_p1 }
   0xd   : > { %s311_s28 = ssub.s32 %s1261_s21, %s1500_s25  ;;  %p1076_p6 = scmp.ge.s32.totalorder %s1265_s22, 1 }
   0xe   : > { %p314_p7 = scmp.eq.s32.totalorder %s311_s28, 0  ;;  %p1379_p8 = por %p333_p5, %p332_p3 }
   0xf   : > { %p422_p9 = scmp.lt.s32.totalorder %s1265_s22, 3 }
  0x10   : > { %s1385_s30 = scalar_select %p314_p7, %s1253_s19, %s316_s26  }
  0x11   : > { %p423_p10 = pnand %p1076_p6, %p422_p9 }
  0x12   : > { %1491 = sst [smem:[#allocation8_spill]] %s1385_s30  ;;  %p489_p11 = scmp.lt.s32.totalorder (!%p423_p10), %s1257_s20, 1 }
  0x13   : > { %426 = sbr.rel (%p423_p10) target bundleno = 566 (0x236), region = 64  ;;  %s1492_s2 = sld [smem:[#allocation9_spill]] (!%p423_p10) }
  0x14   : > { %s1270_s14 = smov (!%p423_p10), 120   ;;  %s486_s15 = sand.u32 (!%p423_p10), 1, %s1249_s18  }
  0x15   : > { %s1090_s19 = sshll.u32 (!%p423_p10), %s1257_s20, 7  ;;  %s1271_s24 = smov (!%p423_p10), [#allocation2]  }
  0x18   : > { %v1267_v0 = vmov 0.0   ;;  %s490_s12 = scalar_select %p489_p11, %s1257_s20, 1  ;;  %vm1268_vm0 = vmmov 0   ;;  %vm543_vm1 = vcmask 1043456   ;;  %vm539_vm2 = vcmask 31744   ;;  %v529_v2 = vld [vmem:[%s1474_s4] sm:$0xff] }
  0x19   : > { %1103 = vmatprep.subr.mxu0 %v1267_v0  ;;  %1108 = vmatprep.subr.mxu1 %v1267_v0  ;;  %v1269_v3 = vmov 0   ;;  %v856_v7 = vld [vmem:[%s1478_s8] sm:$0xff]  ;;  %vm537_vm3 = vcmask 982016   ;;  %vm698_vm4 = vcmask 1040384   ;;  %vm694_vm5 = vcmask 7168  }
  0x1a   : > { %1105 = vmatprep.mubr.msk.f32.mxu0 %vm1268_vm0, %v1267_v0  ;;  %1110 = vmatprep.mubr.msk.f32.mxu1 %vm1268_vm0, %v1267_v0  ;;  %s1078_s13 = sshll.u32 %s490_s12, 2  ;;  %s514_s16 = scalar_lea.vmem %s1492_s2, %s490_s12  ;;  %v773_v11 = vld [vmem:[%s1477_s7] sm:$0xff]  ;;  %vm871_vm6 = vcmask 64512  }
  0x1b   : > { %s495_s26 = scalar_lea.vmem %s1470_s0, %s1078_s13  ;;  %v691_v1 = vld [vmem:[%s514_s16] sm:$0x1]  ;;  %s505_s21 = scalar_lea.vmem %s1471_s1, %s1078_s13  ;;  %1187 = vset.pattern.permute.xlu0 %v1269_v3  ;;  %1188 = vset.pattern.permute.xlu1 %v1269_v3 }
  0x1c   : > { %v527_v4 = vld [vmem:[%s495_s26] sm:$0xf]  ;;  %775 = vrot.lane.b32.xlu1 %v691_v1, %s1270_s14  ;;  %s523_s23 = scalar_lea.vmem %s1473_s3, %s490_s12  ;;  %s960_s12 = scalar_lea.hbm %s1481_s11, %s1090_s19 }
  0x1d   : > { %533 = vrot.lane.b32.xlu0 %v527_v4, %s1270_s14  ;;  %v692_v5 = vld [vmem:[%s523_s23] sm:$0x1]  ;;  %1109 = vmatpush3.msk.msra.mxu1 %vm543_vm1, %v527_v4  ;;  %s1077_s23 = sshll.u32 %s486_s15, 3  ;;  %s948_s13 = scalar_lea.sflag [#allocation3], %s486_s15 }
  0x1e   : > { %v528_v6 = vld [vmem:[%s505_s21] sm:$0xf]  ;;  %1111 = vmatmul.mubr.msk.f32.vlgmr.msra.gmra.mxu1 %vm539_vm2, %v529_v2  ;;  %1118 = vmatprep.subr.mxu1 %v1267_v0  ;;  %s488_s25 = scalar_lea.vmem [#allocation2], %s1077_s23  ;;  %s1193_s26 = sshll.u32 %s1271_s24, 4  ;;  %s1194_s26 = int_to_ptr.vmem [resolvable:$false] %s1193_s26 }
  0x1f   : > { %1120 = vmatprep.mubr.msk.f32.mxu1 %vm1268_vm0, %v1267_v0  ;;  %v530_v14 = vld [vmem:[%s1475_s5] sm:$0xff]  ;;  %s962_s2 = sshll.u32 %s488_s25, 4  ;;  %s1195_s20 = scalar_lea.vmem %s1194_s26, 256  ;;  %s963_s2 = int_to_ptr.vmem [resolvable:$true] %s962_s2 }
  0x20   : > { %777 = vrot.lane.b32.xlu1 %v692_v5, %s1270_s14  ;;  %v693_v16 = vld [vmem:[%s1476_s6] sm:$0xff]  ;;  %s1189_s16 = scalar_lea.vmem %s963_s2, 128  ;;  %p1196_p1 = scmp.lt.s32.totalorder %s963_s2, %s1194_s26 }
  0x21   : > { %535 = vrot.lane.b32.xlu0 %v528_v6, %s1270_s14  ;;  %v865_v19 = vld [vmem:[%s1480_s10] sm:$0xff]  ;;  %p1190_p12 = scmp.ne.s32.totalorder %s963_s2, %s1189_s16  ;;  %p1197_p2 = scmp.lt.s32.totalorder %s1195_s20, %s1189_s16 }
  0x22   : > { %v864_v32 = vld [vmem:[%s1479_s9] sm:$0xff] }
  0x23   : > { %p1191_p13 = pnand %p1190_p12, %p1372_p4  ;;  %p1198_p3 = por %p1197_p2, %p1196_p1 }
  0x24   : > { %868 = vperm.xlu1 %1188, %v865_v19  }
  0x25   : > { %859 = vperm.xlu0 %1187, %v856_v7   ;;  %p1192_p0 = pneg %p1191_p13 }
  0x27   : > { %p1199_p5 = pnand %p1198_p3, %p1192_p0 }
  0x8e   : > { %v776_v8 = vpop.permute.xlu1 %775 }
  0x8f   : > { %v534_v9 = vpop.permute.xlu0 %533 }
  0x92   : > { %v778_v10 = vpop.permute.xlu1 %777 }
  0x93   : > { %v536_v12 = vpop.permute.xlu0 %535  ;;  %v779_v13 = vsel %vm537_vm3, %v776_v8, %v778_v10 }
  0x94   : > { %v538_v15 = vsel %vm537_vm3, %v534_v9, %v536_v12  ;;  %1119 = vmatpush3.msk.msra.mxu1 %vm698_vm4, %v779_v13 }
  0x95   : > { %1104 = vmatpush3.msk.msra.mxu0 %vm543_vm1, %v538_v15  ;;  %1121 = vmatmul.mubr.msk.f32.vlgmr.msra.gmra.mxu1 %vm694_vm5, %v773_v11 }
  0x96   : > { %1106 = vmatmul.mubr.msk.f32.vlgmr.msra.gmra.mxu0 %vm539_vm2, %v530_v14  ;;  %1113 = vmatprep.subr.mxu0 %v1267_v0 }
  0x97   : > { %1114 = vmatpush3.msk.msra.mxu0 %vm698_vm4, %v691_v1  ;;  %1115 = vmatprep.mubr.msk.f32.mxu0 %vm1268_vm0, %v1267_v0 }
  0x98   : > { %1123 = vmatprep.subr.mxu0 %v1267_v0 }
  0x9a   : > { %1116 = vmatmul.mubr.msk.f32.vlgmr.msra.gmra.mxu0 %vm694_vm5, %v693_v16 }
  0x9b   : > { %1125 = vmatprep.mubr.msk.f32.mxu0 %vm1268_vm0, %v1267_v0 }
  0x9f   : > { %v869_v33 = vpop.permute.xlu1 %868 }
  0xa0   : > { %v860_v28 = vpop.permute.xlu0 %859 }
  0xde   : > { %v687_v17 = vpop.f32.mrf.mxu1 }
  0xe0   : > { %v1112_v18 = vpop.f32.mrf.mxu1 }
 0x155   : > { %v851_v20 = vpop.f32.mrf.mxu1 }
 0x156   : > { %v612_v21 = vpop.f32.mrf.mxu0 }
 0x157   : > { %v1122_v22 = vpop.f32.mrf.mxu1  ;;  %v688_v24 = vadd.f32 %v687_v17, %v612_v21 }
 0x158   : > { %v1107_v23 = vpop.f32.mrf.mxu0 }
 0x15a   : > { %v768_v25 = vpop.f32.mrf.mxu0 }
 0x15b   : > { %v772_v26 = vadd.f32 %v768_v25, %v688_v24 }
 0x15c   : > { %v1117_v27 = vpop.f32.mrf.mxu0 }
 0x15d   : > { %v855_v29 = vadd.f32 %v851_v20, %v772_v26 }
 0x15f   : > { %v862_v30 = vadd.f32 %v860_v28, %v855_v29 }
 0x161   : > { %v863_v31 = vmax.f32 %v862_v30, 0.0 }
 0x163   : > { %1124 = vmatpush3.msra.mxu0 %v863_v31 }
 0x164   : > { %1126 = vmatmul.mubr.msk.f32.vlgmr.msra.gmra.mxu0 %vm871_vm6, %v864_v32 }
 0x224   : > { %v941_v34 = vpop.f32.mrf.mxu0 }
 0x225   : > { %v942_v35 = vadd.f32 %v941_v34, %v869_v33 }
 0x226   : > { %v1127_v36 = vpop.f32.mrf.mxu0 }
 0x227   : > { %v945_v37 = vmax.f32 %v942_v35, 0.0 }
 0x229   : > { %946 = vst [vmem:[%s488_s25] sm:$0xff] %v945_v37 }
 0x22a   : > { %1202 = shalt.err (!%p1199_p5)
}
 0x22b   : > { %s1203_s28 = scalar_lea.hbm %s960_s12, 128  ;;  %s1207_s23 = scalar_lea.hbm %s1481_s11, 256 }
 0x22c   : > { %p1204_p6 = scmp.ne.s32.totalorder %s960_s12, %s1203_s28  ;;  %p1208_p10 = scmp.lt.s32.totalorder %s960_s12, %s1481_s11 }
 0x22d   : > { %p1209_p11 = scmp.lt.s32.totalorder %s1207_s23, %s1203_s28 }
 0x22e   : > { %p1205_p7 = pnand %p1204_p6, %p1372_p4 }
 0x22f   : > { %p1210_p12 = por %p1209_p11, %p1208_p10 }
 0x230   : > { %p1206_p9 = pneg %p1205_p7 }
 0x232   : > { %p1211_p13 = pnand %p1210_p12, %p1206_p9 }
 0x234   : > { %1214 = shalt.err (!%p1211_p13)
}
 0x235   : > { %1128 = dma.vmem_to_hbm [thread:$0]  (%p1372_p4), %s963_s2, 128, %s960_s12, %s948_s13  }
 0x236 PF: > { %p1134_p0 = scmp.ge.s32.totalorder %s1265_s22, 2  ;;  %s974_s21 = sand.u32 1, %s1245_s17  }
 0x237   : > { %s975_s30 = scalar_lea.sflag [#allocation3], %s974_s21 }
 0x238   : > { %p1131_p1 = pnand %p1134_p0, %p1379_p8 }
 0x23a   : > { %p1132_p2 = pneg %p1131_p1 }
 0x23c   : > { %1240 = dma.done.wait (%p1132_p2), %s975_s30, 128  }
 0x23d   : > { %1242 = vsyncadd (%p1132_p2), %s975_s30, 4294967168  ;;  %s24_s22 = sadd.s32 1, %s1265_s22   ;;  %s1493_s16 = sld [smem:[#allocation5_spill]] }
 0x23e   : > { %p21_p3 = scmp.ge.s32.totalorder %s24_s22, 4   ;;  %s1494_s19 = sld [smem:[#allocation8_spill]] }
 0x23f   : > { %s1495_s20 = sld [smem:[#allocation6_spill]]  ;;  %s1497_s17 = smov %s1249_s18 }
 0x240   : > { %s1496_s21 = sld [smem:[#allocation7_spill]]  ;;  %23 = sbr.rel (!%p21_p3) target bundleno = 6 (0x6), region = 108 }
 0x243   : > { %s1498_s18 = smov %s1493_s16 }
 0x245   :  { %980 = vsyncpa [#allocation3], 1 }
 0x246   :  { %982 = vsyncpa [#allocation3 + $0x1], 1 }

</bundles_post_ra>
